<compile_context>
chip_gen: v6e
topology: v6e:2x2x1
jax: 0.10.0
libtpu: 0.0.40
codegen_flags: <defaults>
</compile_context>

<pallas_src>
import jax
import jax.numpy as jnp
from jax.experimental import pallas as pl
from jax.experimental.pallas import tpu as pltpu

NUM_SMOOTH_LAYERS = 2  # num_of_smooth_layers (static, unrolled in the kernel)


# ----------------------------- fused kernel --------------------------------- #
def spatial_embedding_kernel(a_ref, e_ref, w_ref, b_ref, x_ref, o_ref, eflat_ref):
    """GCN-smooth the (N, d) embedding, then lane-dense broadcast-add it onto
    one (TM, N*d) row tile of the flattened input.

    a_ref:     (N, N)     normalized adjacency          (VMEM-resident)
    e_ref:     (N, d)     learned node embedding        (VMEM-resident)
    w_ref:     (L, d, d)  per-layer GCN weights         (VMEM-resident)
    b_ref:     (L, 1, d)  per-layer GCN biases          (VMEM-resident)
    x_ref:     (TM, N*d)  row tile of X.reshape(B*T, N*d)
    o_ref:     (TM, N*d)  matching output tile
    eflat_ref: (1,  N*d)  VMEM scratch: flattened smoothed embedding
    """
    N, d = e_ref.shape
    L = w_ref.shape[0]

    # --- GCN smoothing (tiny; fully hidden under the HBM-bound add) -------- #
    # TODO(synk): the `gcn` class is not defined in the reference module; the
    # standard GraphConv smoothing relu(A @ E @ W + b) is assumed.
    a = a_ref[...]
    e = e_ref[...]
    for l in range(L):                                           # static unroll
        ae = jnp.dot(a, e, preferred_element_type=jnp.float32)            # MXU
        e = jnp.dot(ae, w_ref[l], preferred_element_type=jnp.float32)     # MXU
        e = jnp.maximum(e + b_ref[l], 0.0)                                # VPU

    # --- (N, d) -> (1, N*d) lane-dense scatter (static slices only) -------- #
    # Avoids an in-kernel reshape/relayout; N tiny stores per grid step.
    for n in range(N):
        eflat_ref[0:1, n * d:(n + 1) * d] = e[n:n + 1, :]

    # --- streaming broadcast-add; last dim is a multiple of 128 ------------ #
    o_ref[...] = (x_ref[...] + eflat_ref[...]).astype(o_ref.dtype)


# ------------------------------- wrapper ------------------------------------ #
def spatial_embedding_forward(X, A, embed, Ws, bs, *, target_block_bytes=4 << 20):
    B, T, N, d = X.shape
    L = Ws.shape[0]
    BT, ND = B * T, N * d
    assert ND % 128 == 0, "N*d must be a multiple of 128 for lane-dense tiling"

    x_flat = X.reshape(BT, ND)                 # contiguous -> free reshape
    itemsize = jnp.dtype(X.dtype).itemsize

    # Row-tile size: target ~4 MiB per block (double-buffered in + out stays
    # well under v7x's 64 MiB VMEM; v5e/v6e have more headroom).  The toy
    # tensor (16 x 512 f32 = 32 KiB) fits in a single block -> grid=(1,).
    if BT * ND * itemsize <= target_block_bytes:
        block_rows = BT
    else:
        block_rows = max(8, (target_block_bytes // (ND * itemsize)) // 8 * 8)
    num_row_blocks = pl.cdiv(BT, block_rows)

    # Explicit VMEM budget: 2x double-buffered (in + out) row tiles + params.
    vmem_limit = max(int(4 * block_rows * ND * itemsize + (2 << 20)), 16 << 20)

    y_flat = pl.pallas_call(
        spatial_embedding_kernel,
        out_shape=jax.ShapeDtypeStruct((BT, ND), X.dtype),
        grid=(num_row_blocks,),
        in_specs=[
            pl.BlockSpec((N, N), lambda i: (0, 0)),            # A     (resident)
            pl.BlockSpec((N, d), lambda i: (0, 0)),            # embed (resident)
            pl.BlockSpec((L, d, d), lambda i: (0, 0, 0)),      # Ws    (resident)
            pl.BlockSpec((L, 1, d), lambda i: (0, 0, 0)),      # bs    (resident)
            pl.BlockSpec((block_rows, ND), lambda i: (i, 0)),  # X row tile
        ],
        out_specs=pl.BlockSpec((block_rows, ND), lambda i: (i, 0)),
        scratch_shapes=[pltpu.VMEM((1, ND), jnp.float32)],
        compiler_params=pltpu.CompilerParams(
            dimension_semantics=("parallel",),   # independent row tiles -> 2-TC on v7x
            vmem_limit_bytes=vmem_limit,
        ),
    )(A, embed, Ws, bs, x_flat)

    # Dropout(p=0.0) is the identity -> nothing to do.
    return y_flat.reshape(B, T, N, d)


# -------------------------------- main --------------------------------------- #
if __name__ == "__main__":
    key = jax.random.PRNGKey(0)
    B, T, N, d = 2, 8, 16, 32
    k_x, k_e, k_w = jax.random.split(key, 3)

    # Input X (B, T, N, d)
    X = jax.random.normal(k_x, (B, T, N, d), dtype=jnp.float32)

    # nn.Parameter embed (N, d) with Xavier-uniform init.
    bound_e = (6.0 / (N + d)) ** 0.5
    embed = jax.random.uniform(k_e, (N, d), minval=-bound_e, maxval=bound_e,
                               dtype=jnp.float32)

    # GCN weights/biases for NUM_SMOOTH_LAYERS layers.
    bound_w = (6.0 / (d + d)) ** 0.5
    Ws = jax.random.uniform(k_w, (NUM_SMOOTH_LAYERS, d, d),
                            minval=-bound_w, maxval=bound_w, dtype=jnp.float32)
    bs = jnp.zeros((NUM_SMOOTH_LAYERS, 1, d), dtype=jnp.float32)

    # Deterministic normalized adjacency A = D^-1/2 (ring + I) D^-1/2.
    idx = jnp.arange(N)
    adj = jnp.zeros((N, N), jnp.float32)
    adj = adj.at[idx, (idx + 1) % N].set(1.0)
    adj = adj.at[idx, (idx - 1) % N].set(1.0)
    adj = adj + jnp.eye(N, dtype=jnp.float32)
    dinv = 1.0 / jnp.sqrt(adj.sum(axis=1))
    A = adj * dinv[:, None] * dinv[None, :]

    Y = spatial_embedding_forward(X, A, embed, Ws, bs)
    jax.block_until_ready(Y)

    # Pure-JAX reference check.
    e = embed
    for l in range(NUM_SMOOTH_LAYERS):
        e = jnp.maximum(A @ e @ Ws[l] + bs[l], 0.0)
    ref = X + e[None, None]
    assert jnp.allclose(Y, ref, atol=1e-5, rtol=1e-5), "mismatch vs reference"

    print("KERNEL_OK")
</pallas_src>

<mosaic_0001>
module attributes {stable_mosaic.version = 11 : i64} {
  func.func @spatial_embedding_kernel(%arg0: i32, %arg1: memref<16x16xf32, #tpu.memory_space<vmem>>, %arg2: memref<16x32xf32, #tpu.memory_space<vmem>>, %arg3: memref<2x32x32xf32, #tpu.memory_space<vmem>>, %arg4: memref<2x1x32xf32, #tpu.memory_space<vmem>>, %arg5: memref<16x512xf32, #tpu.memory_space<vmem>>, %arg6: memref<16x512xf32, #tpu.memory_space<vmem>>, %arg7: memref<1x512xf32, #tpu.memory_space<vmem>>) attributes {dimension_semantics = [#tpu.dimension_semantics<parallel>], iteration_bounds = array<i64: 1>, scalar_prefetch = 0 : i64, scratch_operands = 1 : i64, tpu.core_type = #tpu.core_type<tc>, window_params = [{pipeline_mode = #tpu.pipeline_mode<synchronous>, transform_indices = @transform_0, window_bounds = array<i64: 16, 16>}, {pipeline_mode = #tpu.pipeline_mode<synchronous>, transform_indices = @transform_1, window_bounds = array<i64: 16, 32>}, {pipeline_mode = #tpu.pipeline_mode<synchronous>, transform_indices = @transform_2, window_bounds = array<i64: 2, 32, 32>}, {pipeline_mode = #tpu.pipeline_mode<synchronous>, transform_indices = @transform_3, window_bounds = array<i64: 2, 1, 32>}, {transform_indices = @transform_4, window_bounds = array<i64: 16, 512>}, {transform_indices = @transform_5, window_bounds = array<i64: 16, 512>}]} {
    %c0 = arith.constant 0 : index
    %c0_0 = arith.constant 0 : index
    %0 = vector.load %arg1[%c0, %c0_0] : memref<16x16xf32, #tpu.memory_space<vmem>>, vector<16x16xf32>
    %c0_1 = arith.constant 0 : index
    %c0_2 = arith.constant 0 : index
    %1 = vector.load %arg2[%c0_1, %c0_2] : memref<16x32xf32, #tpu.memory_space<vmem>>, vector<16x32xf32>
    %cst = arith.constant dense<0.000000e+00> : vector<16x32xf32>
    %2 = tpu.matmul %0, %1, %cst {dimension_numbers = #tpu.dot_dimension_numbers<[1], [0], [0], [1], [0, 0, 1, 1], [], []>} : vector<16x16xf32>, vector<16x32xf32>, vector<16x32xf32> -> vector<16x32xf32>
    %c0_3 = arith.constant 0 : index
    %c0_4 = arith.constant 0 : index
    %c0_5 = arith.constant 0 : index
    %3 = vector.load %arg3[%c0_3, %c0_4, %c0_5] : memref<2x32x32xf32, #tpu.memory_space<vmem>>, vector<1x32x32xf32>
    %4 = vector.shape_cast %3 : vector<1x32x32xf32> to vector<32x32xf32>
    %cst_6 = arith.constant dense<0.000000e+00> : vector<16x32xf32>
    %5 = tpu.matmul %2, %4, %cst_6 {dimension_numbers = #tpu.dot_dimension_numbers<[1], [0], [0], [1], [0, 0, 1, 1], [], []>} : vector<16x32xf32>, vector<32x32xf32>, vector<16x32xf32> -> vector<16x32xf32>
    %c0_7 = arith.constant 0 : index
    %c0_8 = arith.constant 0 : index
    %c0_9 = arith.constant 0 : index
    %6 = vector.load %arg4[%c0_7, %c0_8, %c0_9] : memref<2x1x32xf32, #tpu.memory_space<vmem>>, vector<1x1x32xf32>
    %7 = vector.shape_cast %6 : vector<1x1x32xf32> to vector<1x32xf32>
    %8 = vector.broadcast %7 : vector<1x32xf32> to vector<16x32xf32>
    %9 = arith.addf %5, %8 : vector<16x32xf32>
    %cst_10 = arith.constant 0.000000e+00 : f32
    %10 = vector.broadcast %cst_10 : f32 to vector<16x32xf32>
    %11 = arith.maximumf %9, %10 : vector<16x32xf32>
    %cst_11 = arith.constant dense<0.000000e+00> : vector<16x32xf32>
    %12 = tpu.matmul %0, %11, %cst_11 {dimension_numbers = #tpu.dot_dimension_numbers<[1], [0], [0], [1], [0, 0, 1, 1], [], []>} : vector<16x16xf32>, vector<16x32xf32>, vector<16x32xf32> -> vector<16x32xf32>
    %c1 = arith.constant 1 : index
    %c0_12 = arith.constant 0 : index
    %c0_13 = arith.constant 0 : index
    %13 = vector.load %arg3[%c1, %c0_12, %c0_13] : memref<2x32x32xf32, #tpu.memory_space<vmem>>, vector<1x32x32xf32>
    %14 = vector.shape_cast %13 : vector<1x32x32xf32> to vector<32x32xf32>
    %cst_14 = arith.constant dense<0.000000e+00> : vector<16x32xf32>
    %15 = tpu.matmul %12, %14, %cst_14 {dimension_numbers = #tpu.dot_dimension_numbers<[1], [0], [0], [1], [0, 0, 1, 1], [], []>} : vector<16x32xf32>, vector<32x32xf32>, vector<16x32xf32> -> vector<16x32xf32>
    %c1_15 = arith.constant 1 : index
    %c0_16 = arith.constant 0 : index
    %c0_17 = arith.constant 0 : index
    %16 = vector.load %arg4[%c1_15, %c0_16, %c0_17] : memref<2x1x32xf32, #tpu.memory_space<vmem>>, vector<1x1x32xf32>
    %17 = vector.shape_cast %16 : vector<1x1x32xf32> to vector<1x32xf32>
    %18 = vector.broadcast %17 : vector<1x32xf32> to vector<16x32xf32>
    %19 = arith.addf %15, %18 : vector<16x32xf32>
    %cst_18 = arith.constant 0.000000e+00 : f32
    %20 = vector.broadcast %cst_18 : f32 to vector<16x32xf32>
    %21 = arith.maximumf %19, %20 : vector<16x32xf32>
    %22 = vector.extract_strided_slice %21 {offsets = [0, 0], sizes = [1, 32], strides = [1, 1]} : vector<16x32xf32> to vector<1x32xf32>
    %c0_19 = arith.constant 0 : index
    %c0_20 = arith.constant 0 : index
    %23 = vector.load %arg7[%c0_19, %c0_20] : memref<1x512xf32, #tpu.memory_space<vmem>>, vector<1x32xf32>
    tpu.vector_store %arg7[%c0_19, %c0_20], %22 {strides = array<i32>} : memref<1x512xf32, #tpu.memory_space<vmem>>, vector<1x32xf32>,
    %24 = vector.extract_strided_slice %21 {offsets = [1, 0], sizes = [1, 32], strides = [1, 1]} : vector<16x32xf32> to vector<1x32xf32>
    %c0_21 = arith.constant 0 : index
    %c32 = arith.constant 32 : index
    %25 = vector.load %arg7[%c0_21, %c32] : memref<1x512xf32, #tpu.memory_space<vmem>>, vector<1x32xf32>
    tpu.vector_store %arg7[%c0_21, %c32], %24 {strides = array<i32>} : memref<1x512xf32, #tpu.memory_space<vmem>>, vector<1x32xf32>,
    %26 = vector.extract_strided_slice %21 {offsets = [2, 0], sizes = [1, 32], strides = [1, 1]} : vector<16x32xf32> to vector<1x32xf32>
    %c0_22 = arith.constant 0 : index
    %c64 = arith.constant 64 : index
    %27 = vector.load %arg7[%c0_22, %c64] : memref<1x512xf32, #tpu.memory_space<vmem>>, vector<1x32xf32>
    tpu.vector_store %arg7[%c0_22, %c64], %26 {strides = array<i32>} : memref<1x512xf32, #tpu.memory_space<vmem>>, vector<1x32xf32>,
    %28 = vector.extract_strided_slice %21 {offsets = [3, 0], sizes = [1, 32], strides = [1, 1]} : vector<16x32xf32> to vector<1x32xf32>
    %c0_23 = arith.constant 0 : index
    %c96 = arith.constant 96 : index
    %29 = vector.load %arg7[%c0_23, %c96] : memref<1x512xf32, #tpu.memory_space<vmem>>, vector<1x32xf32>
    tpu.vector_store %arg7[%c0_23, %c96], %28 {strides = array<i32>} : memref<1x512xf32, #tpu.memory_space<vmem>>, vector<1x32xf32>,
    %30 = vector.extract_strided_slice %21 {offsets = [4, 0], sizes = [1, 32], strides = [1, 1]} : vector<16x32xf32> to vector<1x32xf32>
    %c0_24 = arith.constant 0 : index
    %c128 = arith.constant 128 : index
    %31 = vector.load %arg7[%c0_24, %c128] : memref<1x512xf32, #tpu.memory_space<vmem>>, vector<1x32xf32>
    tpu.vector_store %arg7[%c0_24, %c128], %30 {strides = array<i32>} : memref<1x512xf32, #tpu.memory_space<vmem>>, vector<1x32xf32>,
    %32 = vector.extract_strided_slice %21 {offsets = [5, 0], sizes = [1, 32], strides = [1, 1]} : vector<16x32xf32> to vector<1x32xf32>
    %c0_25 = arith.constant 0 : index
    %c160 = arith.constant 160 : index
    %33 = vector.load %arg7[%c0_25, %c160] : memref<1x512xf32, #tpu.memory_space<vmem>>, vector<1x32xf32>
    tpu.vector_store %arg7[%c0_25, %c160], %32 {strides = array<i32>} : memref<1x512xf32, #tpu.memory_space<vmem>>, vector<1x32xf32>,
    %34 = vector.extract_strided_slice %21 {offsets = [6, 0], sizes = [1, 32], strides = [1, 1]} : vector<16x32xf32> to vector<1x32xf32>
    %c0_26 = arith.constant 0 : index
    %c192 = arith.constant 192 : index
    %35 = vector.load %arg7[%c0_26, %c192] : memref<1x512xf32, #tpu.memory_space<vmem>>, vector<1x32xf32>
    tpu.vector_store %arg7[%c0_26, %c192], %34 {strides = array<i32>} : memref<1x512xf32, #tpu.memory_space<vmem>>, vector<1x32xf32>,
    %36 = vector.extract_strided_slice %21 {offsets = [7, 0], sizes = [1, 32], strides = [1, 1]} : vector<16x32xf32> to vector<1x32xf32>
    %c0_27 = arith.constant 0 : index
    %c224 = arith.constant 224 : index
    %37 = vector.load %arg7[%c0_27, %c224] : memref<1x512xf32, #tpu.memory_space<vmem>>, vector<1x32xf32>
    tpu.vector_store %arg7[%c0_27, %c224], %36 {strides = array<i32>} : memref<1x512xf32, #tpu.memory_space<vmem>>, vector<1x32xf32>,
    %38 = vector.extract_strided_slice %21 {offsets = [8, 0], sizes = [1, 32], strides = [1, 1]} : vector<16x32xf32> to vector<1x32xf32>
    %c0_28 = arith.constant 0 : index
    %c256 = arith.constant 256 : index
    %39 = vector.load %arg7[%c0_28, %c256] : memref<1x512xf32, #tpu.memory_space<vmem>>, vector<1x32xf32>
    tpu.vector_store %arg7[%c0_28, %c256], %38 {strides = array<i32>} : memref<1x512xf32, #tpu.memory_space<vmem>>, vector<1x32xf32>,
    %40 = vector.extract_strided_slice %21 {offsets = [9, 0], sizes = [1, 32], strides = [1, 1]} : vector<16x32xf32> to vector<1x32xf32>
    %c0_29 = arith.constant 0 : index
    %c288 = arith.constant 288 : index
    %41 = vector.load %arg7[%c0_29, %c288] : memref<1x512xf32, #tpu.memory_space<vmem>>, vector<1x32xf32>
    tpu.vector_store %arg7[%c0_29, %c288], %40 {strides = array<i32>} : memref<1x512xf32, #tpu.memory_space<vmem>>, vector<1x32xf32>,
    %42 = vector.extract_strided_slice %21 {offsets = [10, 0], sizes = [1, 32], strides = [1, 1]} : vector<16x32xf32> to vector<1x32xf32>
    %c0_30 = arith.constant 0 : index
    %c320 = arith.constant 320 : index
    %43 = vector.load %arg7[%c0_30, %c320] : memref<1x512xf32, #tpu.memory_space<vmem>>, vector<1x32xf32>
    tpu.vector_store %arg7[%c0_30, %c320], %42 {strides = array<i32>} : memref<1x512xf32, #tpu.memory_space<vmem>>, vector<1x32xf32>,
    %44 = vector.extract_strided_slice %21 {offsets = [11, 0], sizes = [1, 32], strides = [1, 1]} : vector<16x32xf32> to vector<1x32xf32>
    %c0_31 = arith.constant 0 : index
    %c352 = arith.constant 352 : index
    %45 = vector.load %arg7[%c0_31, %c352] : memref<1x512xf32, #tpu.memory_space<vmem>>, vector<1x32xf32>
    tpu.vector_store %arg7[%c0_31, %c352], %44 {strides = array<i32>} : memref<1x512xf32, #tpu.memory_space<vmem>>, vector<1x32xf32>,
    %46 = vector.extract_strided_slice %21 {offsets = [12, 0], sizes = [1, 32], strides = [1, 1]} : vector<16x32xf32> to vector<1x32xf32>
    %c0_32 = arith.constant 0 : index
    %c384 = arith.constant 384 : index
    %47 = vector.load %arg7[%c0_32, %c384] : memref<1x512xf32, #tpu.memory_space<vmem>>, vector<1x32xf32>
    tpu.vector_store %arg7[%c0_32, %c384], %46 {strides = array<i32>} : memref<1x512xf32, #tpu.memory_space<vmem>>, vector<1x32xf32>,
    %48 = vector.extract_strided_slice %21 {offsets = [13, 0], sizes = [1, 32], strides = [1, 1]} : vector<16x32xf32> to vector<1x32xf32>
    %c0_33 = arith.constant 0 : index
    %c416 = arith.constant 416 : index
    %49 = vector.load %arg7[%c0_33, %c416] : memref<1x512xf32, #tpu.memory_space<vmem>>, vector<1x32xf32>
    tpu.vector_store %arg7[%c0_33, %c416], %48 {strides = array<i32>} : memref<1x512xf32, #tpu.memory_space<vmem>>, vector<1x32xf32>,
    %50 = vector.extract_strided_slice %21 {offsets = [14, 0], sizes = [1, 32], strides = [1, 1]} : vector<16x32xf32> to vector<1x32xf32>
    %c0_34 = arith.constant 0 : index
    %c448 = arith.constant 448 : index
    %51 = vector.load %arg7[%c0_34, %c448] : memref<1x512xf32, #tpu.memory_space<vmem>>, vector<1x32xf32>
    tpu.vector_store %arg7[%c0_34, %c448], %50 {strides = array<i32>} : memref<1x512xf32, #tpu.memory_space<vmem>>, vector<1x32xf32>,
    %52 = vector.extract_strided_slice %21 {offsets = [15, 0], sizes = [1, 32], strides = [1, 1]} : vector<16x32xf32> to vector<1x32xf32>
    %c0_35 = arith.constant 0 : index
    %c480 = arith.constant 480 : index
    %53 = vector.load %arg7[%c0_35, %c480] : memref<1x512xf32, #tpu.memory_space<vmem>>, vector<1x32xf32>
    tpu.vector_store %arg7[%c0_35, %c480], %52 {strides = array<i32>} : memref<1x512xf32, #tpu.memory_space<vmem>>, vector<1x32xf32>,
    %c0_36 = arith.constant 0 : index
    %c0_37 = arith.constant 0 : index
    %54 = vector.load %arg5[%c0_36, %c0_37] : memref<16x512xf32, #tpu.memory_space<vmem>>, vector<16x512xf32>
    %c0_38 = arith.constant 0 : index
    %c0_39 = arith.constant 0 : index
    %55 = vector.load %arg7[%c0_38, %c0_39] : memref<1x512xf32, #tpu.memory_space<vmem>>, vector<1x512xf32>
    %56 = vector.broadcast %55 : vector<1x512xf32> to vector<16x512xf32>
    %57 = arith.addf %54, %56 : vector<16x512xf32>
    %c0_40 = arith.constant 0 : index
    %c0_41 = arith.constant 0 : index
    %58 = vector.load %arg6[%c0_40, %c0_41] : memref<16x512xf32, #tpu.memory_space<vmem>>, vector<16x512xf32>
    tpu.vector_store %arg6[%c0_40, %c0_41], %57 {strides = array<i32>} : memref<16x512xf32, #tpu.memory_space<vmem>>, vector<16x512xf32>,
    return
  }
  func.func @transform_0(%arg0: i32) -> (i32, i32) {
    %c0_i32 = arith.constant 0 : i32
    %c0_i32_0 = arith.constant 0 : i32
    %c0_i32_1 = arith.constant 0 : i32
    return %c0_i32, %c0_i32_0 : i32, i32
  }
  func.func @transform_1(%arg0: i32) -> (i32, i32) {
    %c0_i32 = arith.constant 0 : i32
    %c0_i32_0 = arith.constant 0 : i32
    %c0_i32_1 = arith.constant 0 : i32
    return %c0_i32, %c0_i32_0 : i32, i32
  }
  func.func @transform_2(%arg0: i32) -> (i32, i32, i32) {
    %c0_i32 = arith.constant 0 : i32
    %c0_i32_0 = arith.constant 0 : i32
    %c0_i32_1 = arith.constant 0 : i32
    %c0_i32_2 = arith.constant 0 : i32
    return %c0_i32, %c0_i32_0, %c0_i32_1 : i32, i32, i32
  }
  func.func @transform_3(%arg0: i32) -> (i32, i32, i32) {
    %c0_i32 = arith.constant 0 : i32
    %c0_i32_0 = arith.constant 0 : i32
    %c0_i32_1 = arith.constant 0 : i32
    %c0_i32_2 = arith.constant 0 : i32
    return %c0_i32, %c0_i32_0, %c0_i32_1 : i32, i32, i32
  }
  func.func @transform_4(%arg0: i32) -> (i32, i32) {
    %c0_i32 = arith.constant 0 : i32
    %c0_i32_0 = arith.constant 0 : i32
    return %arg0, %c0_i32 : i32, i32
  }
  func.func @transform_5(%arg0: i32) -> (i32, i32) {
    %c0_i32 = arith.constant 0 : i32
    %c0_i32_0 = arith.constant 0 : i32
    return %arg0, %c0_i32 : i32, i32
  }
}

</mosaic_0001>

<bundles_post_ra>
// kernel: tpu_custom_call.1
= control target key start
LH: loop header
LB: loop body
LE: loop exit
PB: predicated region body
PF: predicated region fallthrough
CT: control target
= control target key end

     0   :  { %10 = vsyncpa [#allocation4], 0  ;;  %s979_s0 = inlined_call_operand.hbm [shape: f32[16,16], index: 0, kind: input, shape index: {}]   ;;  %s980_s1 = inlined_call_operand.hbm [shape: f32[16,32], index: 1, kind: input, shape index: {}]   ;;  %s981_s2 = inlined_call_operand.hbm [shape: f32[2,32,32], index: 2, kind: input, shape index: {}]   ;;  %s982_s3 = inlined_call_operand.vmem [shape: f32[2,1,32], index: 3, kind: input, shape index: {}]   ;;  %s983_s4 = inlined_call_operand.hbm [shape: f32[16,512], index: 4, kind: input, shape index: {}]   ;;  %s984_s5 = inlined_call_operand.hbm [shape: f32[16,512], index: 5, kind: output, shape index: {}]  }
   0x1   :  { %11 = vsyncpa [#allocation7], 0 }
   0x2   :  { %12 = vsyncpa [#allocation10], 0 }
   0x3   :  { %13 = vsyncpa [#allocation5], 0  ;;  %s847_s18 = smov [#allocation6]   ;;  %s848_s20 = smov [#allocation3]  }
   0x4   :  { %s31_s19 = sshll.u32 %s847_s18, 4  ;;  %s19_s21 = sshll.u32 %s848_s20, 4  ;;  %s32_s19 = int_to_ptr.vmem [resolvable:$true] %s31_s19  ;;  %s20_s21 = int_to_ptr.vmem [resolvable:$true] %s19_s21 }
   0x5   :  { %s747_s22 = scalar_lea.vmem %s32_s19, 256  ;;  %p752_p1 = scmp.lt.s32.totalorder %s32_s19, %s32_s19 }
   0x6   :  { %p748_p0 = scmp.ne.s32.totalorder %s32_s19, %s747_s22  ;;  %p753_p2 = scmp.lt.s32.totalorder %s747_s22, %s747_s22 }
   0x8   :  { %p754_p3 = por %p753_p2, %p752_p1 }
   0xa   :  { %p755_p4 = pnand %p754_p3, %p748_p0 }
   0xc   :  { %758 = shalt.err (!%p755_p4)
}
   0xd   :  { %s849_s23 = smov 128   ;;  %s850_s24 = smov 8  }
   0xe   :  { %37 = dma.hbm_to_vmem [thread:$0]  %s980_s1, 256, %s32_s19, [#allocation7], %s849_s23, %s849_s23, %s850_s24  }
   0xf   :  { %s767_s27 = scalar_lea.vmem %s20_s21, 256  ;;  %p772_p6 = scmp.lt.s32.totalorder %s20_s21, %s20_s21 }
  0x10   :  { %p768_p5 = scmp.ne.s32.totalorder %s20_s21, %s767_s27  ;;  %p773_p7 = scmp.lt.s32.totalorder %s767_s27, %s767_s27 }
  0x12   :  { %p774_p8 = por %p773_p7, %p772_p6 }
  0x14   :  { %p775_p9 = pnand %p774_p8, %p768_p5 }
  0x16   :  { %778 = shalt.err (!%p775_p9)
}
  0x17   :  { %25 = dma.hbm_to_vmem [thread:$0]  %s979_s0, 256, %s20_s21, [#allocation4], %s849_s23, %s849_s23, %s850_s24  }
  0x18   :  { %s851_s30 = smov [#allocation8]   ;;  %s852_s7 = smov [#allocation9]  }
  0x19   :  { %s43_s6 = sshll.u32 %s851_s30, 4  ;;  %s57_s8 = sshll.u32 %s852_s7, 4  ;;  %s44_s6 = int_to_ptr.vmem [resolvable:$true] %s43_s6  ;;  %s58_s8 = int_to_ptr.vmem [resolvable:$true] %s57_s8 }
  0x1a   :  { %s787_s9 = scalar_lea.vmem %s44_s6, 1024  ;;  %p792_p11 = scmp.lt.s32.totalorder %s44_s6, %s44_s6 }
  0x1b   :  { %p788_p10 = scmp.ne.s32.totalorder %s44_s6, %s787_s9  ;;  %p793_p12 = scmp.lt.s32.totalorder %s787_s9, %s787_s9 }
  0x1d   :  { %p794_p13 = por %p793_p12, %p792_p11 }
  0x1f   :  { %p795_p0 = pnand %p794_p13, %p788_p10 }
  0x21   :  { %798 = shalt.err (!%p795_p0)
}
  0x22   :  { %49 = dma.hbm_to_vmem [thread:$0]  %s981_s2, 1024, %s44_s6, [#allocation7], %s849_s23, %s849_s23, %s850_s24  }
  0x23   :  { %s807_s11 = scalar_lea.vmem %s58_s8, 1024  ;;  %p812_p2 = scmp.lt.s32.totalorder %s58_s8, %s58_s8 }
  0x24   :  { %p808_p1 = scmp.ne.s32.totalorder %s58_s8, %s807_s11  ;;  %p813_p3 = scmp.lt.s32.totalorder %s807_s11, %s807_s11 }
  0x26   :  { %p814_p4 = por %p813_p3, %p812_p2 }
  0x28   :  { %p815_p5 = pnand %p814_p4, %p808_p1 }
  0x2a   :  { %818 = shalt.err (!%p815_p5)
}
  0x2b   :  { %s853_s0 = smov 512   ;;  %s854_s12 = smov 32  }
  0x2c   :  { %63 = dma.hbm_to_vmem [thread:$0]  %s983_s4, 1024, %s58_s8, [#allocation10], %s853_s0, %s853_s0, %s854_s12  }
  0x2d   :  { %839 = dma.done.wait [#allocation4], 256  }
  0x2e   :  { %840 = vsyncadd [#allocation4], 4294967040 }
  0x2f   :  { %841 = dma.done.wait [#allocation7], 1280  }
  0x30   :  { %842 = vsyncadd [#allocation7], 4294966016 }
  0x31   :  { %843 = dma.done.wait [#allocation10], 1024  }
  0x32   :  { %844 = vsyncadd [#allocation10], 4294966272  ;;  %vm80_vm0 = vcmask 130048   ;;  %v79_v0 = vld [vmem:[#allocation6 + $0x8] sm:$0xff]  ;;  %v78_v1 = vld [vmem:[#allocation6] sm:$0xff]  ;;  %vm173_vm1 = vcmask 261120   ;;  %v428_v23 = vlaneseq }
  0x33   :  { %v76_v2 = vld [vmem:[#allocation3] sm:$0xff]  ;;  %691 = vmatprep.subr.mxu1 %v79_v0  ;;  %v77_v3 = vld [vmem:[#allocation3 + $0x8] sm:$0xff]  ;;  %v165_v4 = vld [vmem:[#allocation8 + $0x18] sm:$0xff]  ;;  %v855_v24 = vmov 1966171168   ;;  %s857_s17 = smov 96  }
  0x34   :  { %695 = vmatprep.mubr.msk.f32.mxu1 %vm80_vm0, %v76_v2  ;;  %692 = vmatpush3.msra.mxu1 %v79_v0  ;;  %v164_v5 = vld [vmem:[#allocation8 + $0x10] sm:$0xff]  ;;  %v163_v6 = vld [vmem:[#allocation8 + $0x8] sm:$0xff]  ;;  %v162_v7 = vld [vmem:[#allocation8] sm:$0xff]  ;;  %v435_v25 = vunpack.c.l.s4 %v855_v24  ;;  %v916_v26 = vshrl.u32 %v428_v23, 7  ;;  %vm923_vm2 = vcmp.lt.s32.totalorder %v428_v23, 32  ;;  %vm459_vm3 = vcmp.ge.s32.totalorder %v428_v23, 32 }
  0x35   :  { %713 = vmatprep.mubr.msk.f32.mxu0 %vm80_vm0, %v76_v2  ;;  %693 = vmatprep.subr.mxu1 %v78_v1  ;;  %v662_v10 = vld [vmem:[%s982_s3] ss:$0 sm:$0xff]  ;;  %v335_v18 = vld [vmem:[#allocation8 + $0x30] sm:$0xff]  ;;  %v334_v19 = vld [vmem:[#allocation8 + $0x28] sm:$0xff]  ;;  %vm460_vm4 = vcmp.lt.s32.totalorder %v428_v23, 64  ;;  %vm467_vm5 = vcmp.ge.s32.totalorder %v428_v23, 64 }
  0x36   :  { %694 = vmatpush3.msra.mxu1 %v78_v1  ;;  %v336_v17 = vld [vmem:[#allocation8 + $0x38] sm:$0xff]  ;;  %v333_v20 = vld [vmem:[#allocation8 + $0x20] sm:$0xff]  ;;  %v436_v27 = vunpack.c.0.s8 %v435_v25  ;;  %vm468_vm6 = vcmp.lt.s32.totalorder %v428_v23, 96  ;;  %vm943_vm7 = vmand %vm459_vm3, %vm460_vm4  ;;  %vm475_vm9 = vcmp.ge.s32.totalorder %v428_v23, 96  ;;  %vm476_vm10 = vcmp.lt.s32.totalorder %v428_v23, 128  ;;  %s858_s18 = smov [#allocation11]  }
  0x37   :  { %696 = vmatmul.mubr.msk.f32.vlgmr.msra.gmra.mxu1 %vm80_vm0, %v77_v3  ;;  %698 = vmatprep.subr.mxu1 %v165_v4  ;;  %v668_v28 = vld [vmem:[%s982_s3 + $0x1] ss:$0 sm:$0xff]  ;;  %s856_s3 = smov 64   ;;  %vm947_vm8 = vmand %vm467_vm5, %vm468_vm6  ;;  %v600_v23 = vld [vmem:[#allocation9 + $0x28] sm:$0xff]  ;;  %s646_s19 = sshll.u32 %s858_s18, 4  ;;  %s647_s19 = int_to_ptr.vmem [resolvable:$true] %s646_s19 }
  0x38   :  { %699 = vmatpush3.msra.mxu1 %v165_v4  ;;  %v439_v31 = vsub.s32 %v436_v27, %v916_v26  ;;  %vm477_vm11 = vmand %vm475_vm9, %vm476_vm10  ;;  %v601_v24 = vld [vmem:[#allocation9 + $0x30] sm:$0xff]  ;;  %v602_v25 = vld [vmem:[#allocation9 + $0x38] sm:$0xff]  ;;  %s819_s20 = scalar_lea.vmem %s647_s19, 1024  ;;  %p824_p7 = scmp.lt.s32.totalorder %s647_s19, %s647_s19 }
  0x39   :  { %700 = vmatprep.subr.mxu1 %v164_v5  ;;  %p820_p6 = scmp.ne.s32.totalorder %s647_s19, %s819_s20  ;;  %p825_p8 = scmp.lt.s32.totalorder %s819_s20, %s819_s20 }
  0x3a   :  { %701 = vmatpush3.msra.mxu1 %v164_v5 }
  0x3b   :  { %702 = vmatprep.subr.mxu1 %v163_v6  ;;  %p826_p9 = por %p825_p8, %p824_p7 }
  0x3c   :  { %703 = vmatpush3.msra.mxu1 %v163_v6 }
  0x3d   :  { %704 = vmatprep.subr.mxu1 %v162_v7  ;;  %p827_p10 = pnand %p826_p9, %p820_p6 }
  0x3e   :  { %705 = vmatpush3.msra.mxu1 %v162_v7 }
  0xf7   :  { %v697_v8 = vpop.f32.mrf.mxu1 }
  0xf9   :  { %v153_v9 = vpop.f32.mrf.mxu1 }
  0xfa   :  { %706 = vmatprep.mubr.msk.f32.mxu1 %vm173_vm1, %v153_v9 }
  0xfb   :  { %707 = vmatmul.mubr.msk.f32.vlgmr.msra.gmra.mxu1 %vm173_vm1, %v697_v8 }
 0x1bb   :  { %v708_v11 = vpop.f32.mrf.mxu1 }
 0x1bc   :  { %v252_v12 = vadd.f32 %v708_v11, %v662_v10 }
 0x1bd   :  { %v246_v13 = vpop.f32.mrf.mxu1 }
 0x1be   :  { %v256_v14 = vmax.f32 %v252_v12, 0.0  ;;  %v247_v15 = vadd.f32 %v662_v10, %v246_v13  ;;  %v607_v13 = vsub.s32 0, %v916_v26 }
 0x1c0   :  { %v255_v16 = vmax.f32 %v247_v15, 0.0  ;;  %709 = vmatprep.subr.mxu0 %v256_v14  ;;  %v615_v15 = vsub.s32 2, %v916_v26 }
 0x1c1   :  { %710 = vmatpush3.msra.mxu0 %v256_v14  ;;  %v611_v14 = vsub.s32 1, %v916_v26 }
 0x1c2   :  { %711 = vmatprep.subr.mxu0 %v255_v16 }
 0x1c3   :  { %712 = vmatpush3.msra.mxu0 %v255_v16  ;;  %v619_v16 = vsub.s32 3, %v916_v26 }
 0x1c4   :  { %714 = vmatmul.mubr.msk.f32.vlgmr.msra.gmra.mxu0 %vm80_vm0, %v77_v3  ;;  %716 = vmatprep.subr.mxu0 %v336_v17 }
 0x1c5   :  { %717 = vmatpush3.msra.mxu0 %v336_v17  ;;  %v595_v17 = vld [vmem:[#allocation9] sm:$0xff] }
 0x1c6   :  { %718 = vmatprep.subr.mxu0 %v335_v18 }
 0x1c7   :  { %719 = vmatpush3.msra.mxu0 %v335_v18  ;;  %v596_v18 = vld [vmem:[#allocation9 + $0x8] sm:$0xff] }
 0x1c8   :  { %720 = vmatprep.subr.mxu0 %v334_v19 }
 0x1c9   :  { %721 = vmatpush3.msra.mxu0 %v334_v19  ;;  %v597_v19 = vld [vmem:[#allocation9 + $0x10] sm:$0xff] }
 0x1ca   :  { %722 = vmatprep.subr.mxu0 %v333_v20 }
 0x1cb   :  { %723 = vmatpush3.msra.mxu0 %v333_v20  ;;  %v598_v20 = vld [vmem:[#allocation9 + $0x18] sm:$0xff] }
 0x284   :  { %v715_v21 = vpop.f32.mrf.mxu0 }
 0x286   :  { %v323_v22 = vpop.f32.mrf.mxu0 }
 0x287   :  { %724 = vmatprep.mubr.msk.f32.mxu0 %vm173_vm1, %v323_v22 }
 0x288   :  { %725 = vmatmul.mubr.msk.f32.vlgmr.msra.gmra.mxu0 %vm173_vm1, %v715_v21  ;;  %v599_v21 = vld [vmem:[#allocation9 + $0x20] sm:$0xff] }
 0x348   :  { %v726_v29 = vpop.f32.mrf.mxu0 }
 0x349   :  { %v423_v30 = vadd.f32 %v726_v29, %v668_v28 }
 0x34a   :  { %v417_v33 = vpop.f32.mrf.mxu0 }
 0x34b   :  { %v427_v34 = vmax.f32 %v423_v30, 0.0  ;;  %v418_v35 = vadd.f32 %v668_v28, %v417_v33 }
 0x34d   :  { %518 = vst.msk [vmem:[#allocation2 + $0x2] sm:$0x1] %vm923_vm2, %v427_v34  ;;  %v556_v36 = vcombine.high %v427_v34, %v427_v34  ;;  %v426_v37 = vmax.f32 %v418_v35, 0.0  ;;  %v526_v38 = vrot.slane %v427_v34, %v439_v31 }
 0x34f   :  { %432 = vst.msk [vmem:[#allocation2] sm:$0x1] %vm923_vm2, %v426_v37  ;;  %v479_v39 = vcombine.high %v426_v37, %v426_v37  ;;  %v534_v40 = vrot.slane %v526_v38, %v439_v31  ;;  %v527_v41 = vcombine.high %v526_v38, %v526_v38  ;;  %v563_v42 = vrot.slane %v556_v36, %v439_v31 }
 0x350   :  { %v440_v43 = vrot.slane %v426_v37, %v439_v31 }
 0x351   :  { %v486_v44 = vrot.slane %v479_v39, %v439_v31  ;;  %v546_v45 = vcombine.high %v534_v40, %v534_v40  ;;  %v541_v46 = vrot.slane %v527_v41, %v439_v31  ;;  %v573_v47 = vcombine.high %v563_v42, %v563_v42 }
 0x352   :  { %v441_v48 = vcombine.high %v440_v43, %v440_v43  ;;  %v570_v49 = vrot.slane %v563_v42, %v439_v31  ;;  %v448_v53 = vrot.slane %v440_v43, %v439_v31 }
 0x353   :  { %547 = vrot.lane.b32.xlu0 %v546_v45, %s856_s3  ;;  %542 = vrot.lane.b32.xlu1 %v541_v46, %s854_s12  ;;  %v493_v50 = vrot.slane %v486_v44, %v439_v31  ;;  %v580_v51 = vrot.slane %v573_v47, %v439_v31  ;;  %v496_v56 = vcombine.high %v486_v44, %v486_v44 }
 0x354   :  { %572 = vst.msk [vmem:[#allocation2 + $0x3] sm:$0x1] %vm923_vm2, %v570_v49  ;;  %v455_v52 = vrot.slane %v441_v48, %v439_v31  ;;  %v585_v54 = vcombine.high %v570_v49, %v570_v49  ;;  %v463_v55 = vcombine.high %v448_v53, %v448_v53  ;;  %v551_v61 = vcombine.high %v541_v46, %v541_v46 }
 0x355   :  { %495 = vst.msk [vmem:[#allocation2 + $0x1] sm:$0x1] %vm923_vm2, %v493_v50  ;;  %v508_v57 = vcombine.high %v493_v50, %v493_v50  ;;  %v503_v58 = vrot.slane %v496_v56, %v439_v31  ;;  %v590_v62 = vcombine.high %v580_v51, %v580_v51 }
 0x356   :  { %v471_v59 = vcombine.high %v455_v52, %v455_v52 }
 0x357   :  { %581 = vrot.lane.b32.xlu1 %v580_v51, %s854_s12  ;;  %456 = vrot.lane.b32.xlu0 %v455_v52, %s854_s12  ;;  %v513_v60 = vcombine.high %v503_v58, %v503_v58 }
 0x35b   :  { %586 = vrot.lane.b32.xlu1 %v585_v54, %s856_s3  ;;  %464 = vrot.lane.b32.xlu0 %v463_v55, %s856_s3 }
 0x35f   :  { %509 = vrot.lane.b32.xlu1 %v508_v57, %s856_s3  ;;  %504 = vrot.lane.b32.xlu0 %v503_v58, %s854_s12 }
 0x363   :  { %514 = vrot.lane.b32.xlu1 %v513_v60, %s857_s17  ;;  %472 = vrot.lane.b32.xlu0 %v471_v59, %s857_s17 }
 0x367   :  { %591 = vrot.lane.b32.xlu1 %v590_v62, %s857_s17  ;;  %552 = vrot.lane.b32.xlu0 %v551_v61, %s857_s17 }
 0x3c5   :  { %v548_v1 = vpop.permute.xlu0 %547  ;;  %v543_v2 = vpop.permute.xlu1 %542 }
 0x3c6   :  { %545 = vst.msk [vmem:[#allocation2 + $0x2] sm:$0x1] %vm943_vm7, %v543_v2 }
 0x3c7   :  { %550 = vst.msk [vmem:[#allocation2 + $0x2] sm:$0x1] %vm947_vm8, %v548_v1 }
 0x3c9   :  { %v582_v3 = vpop.permute.xlu1 %581  ;;  %v457_v4 = vpop.permute.xlu0 %456 }
 0x3ca   :  { %584 = vst.msk [vmem:[#allocation2 + $0x3] sm:$0x1] %vm943_vm7, %v582_v3  ;;  %462 = vst.msk [vmem:[#allocation2] sm:$0x1] %vm943_vm7, %v457_v4 }
 0x3cd   :  { %v587_v5 = vpop.permute.xlu1 %586  ;;  %v465_v6 = vpop.permute.xlu0 %464 }
 0x3ce   :  { %589 = vst.msk [vmem:[#allocation2 + $0x3] sm:$0x1] %vm947_vm8, %v587_v5  ;;  %470 = vst.msk [vmem:[#allocation2] sm:$0x1] %vm947_vm8, %v465_v6 }
 0x3d1   :  { %v510_v7 = vpop.permute.xlu1 %509  ;;  %v505_v8 = vpop.permute.xlu0 %504 }
 0x3d2   :  { %507 = vst.msk [vmem:[#allocation2 + $0x1] sm:$0x1] %vm943_vm7, %v505_v8 }
 0x3d3   :  { %512 = vst.msk [vmem:[#allocation2 + $0x1] sm:$0x1] %vm947_vm8, %v510_v7 }
 0x3d5   :  { %v515_v9 = vpop.permute.xlu1 %514  ;;  %v473_v10 = vpop.permute.xlu0 %472 }
 0x3d6   :  { %517 = vst.msk [vmem:[#allocation2 + $0x1] sm:$0x1] %vm477_vm11, %v515_v9  ;;  %478 = vst.msk [vmem:[#allocation2] sm:$0x1] %vm477_vm11, %v473_v10 }
 0x3d9   :  { %v592_v11 = vpop.permute.xlu1 %591  ;;  %v553_v12 = vpop.permute.xlu0 %552 }
 0x3da   :  { %594 = vst.msk [vmem:[#allocation2 + $0x3] sm:$0x1] %vm477_vm11, %v592_v11  ;;  %555 = vst.msk [vmem:[#allocation2 + $0x2] sm:$0x1] %vm477_vm11, %v553_v12 }
 0x3e1   :  { %v603_v22 = vld [vmem:[#allocation2] sm:$0xf] }
 0x3e2   :  { %v608_v27 = vrot.slane %v603_v22, %v607_v13  ;;  %v612_v28 = vrot.slane %v603_v22, %v611_v14  ;;  %v616_v29 = vrot.slane %v603_v22, %v615_v15  ;;  %v620_v30 = vrot.slane %v603_v22, %v619_v16 }
 0x3e4   :  { %v625_v31 = vadd.f32 %v608_v27, %v595_v17  ;;  %v626_v32 = vadd.f32 %v612_v28, %v596_v18  ;;  %v627_v33 = vadd.f32 %v616_v29, %v597_v19  ;;  %v628_v34 = vadd.f32 %v620_v30, %v598_v20 }
 0x3e5   :  { %v629_v26 = vadd.f32 %v608_v27, %v599_v21  ;;  %v630_v35 = vadd.f32 %v612_v28, %v600_v23  ;;  %v631_v36 = vadd.f32 %v616_v29, %v601_v24  ;;  %v632_v37 = vadd.f32 %v620_v30, %v602_v25 }
 0x3e6   :  { %633 = vst [vmem:[#allocation11] sm:$0xff] %v625_v31  ;;  %634 = vst [vmem:[#allocation11 + $0x8] sm:$0xff] %v626_v32 }
 0x3e7   :  { %635 = vst [vmem:[#allocation11 + $0x10] sm:$0xff] %v627_v33  ;;  %636 = vst [vmem:[#allocation11 + $0x18] sm:$0xff] %v628_v34 }
 0x3e8   :  { %637 = vst [vmem:[#allocation11 + $0x20] sm:$0xff] %v629_v26  ;;  %638 = vst [vmem:[#allocation11 + $0x28] sm:$0xff] %v630_v35 }
 0x3e9   :  { %639 = vst [vmem:[#allocation11 + $0x30] sm:$0xff] %v631_v36  ;;  %640 = vst [vmem:[#allocation11 + $0x38] sm:$0xff] %v632_v37 }
 0x3ea   :  { %830 = shalt.err (!%p827_p10)
}
 0x3eb   :  { %652 = dma.vmem_to_hbm [thread:$0]  %s647_s19, 1024, %s984_s5, [#allocation5], %s853_s0, %s853_s0, %s854_s12  }
 0x3ec   :  { %845 = dma.done.wait [#allocation5], 1024  }
 0x3ed   :  { %846 = vsyncadd [#allocation5], 4294966272 }
 0x3ee   :  { %656 = vsyncpa [#allocation4], 1 }
 0x3ef   :  { %657 = vsyncpa [#allocation7], 1 }
 0x3f0   :  { %658 = vsyncpa [#allocation10], 1 }
 0x3f1   :  { %659 = vsyncpa [#allocation5], 1 }

</bundles_post_ra>
